<compile_context>
chip_gen: v7x
topology: tpu7x:2x2x1
jax: 0.10.0
libtpu: 0.0.40
codegen_flags: <defaults>
</compile_context>

<pallas_src>
import math
import functools

import numpy as np
import jax
import jax.numpy as jnp
from jax import lax
from jax.experimental import pallas as pl
from jax.experimental.pallas import tpu as pltpu

_AMIN = 1e-10
_TOP_DB = 80.0
_DB_SCALE = 10.0 / math.log(10.0)     # 10*log10(x) == _DB_SCALE * ln(x)
_FB_PAD = 128                         # lane-dense width of the filterbank/dB axis
_NEG_BIG = -1.0e30                    # "minus infinity" for masked max entries


def _round_up(x, m):
    return (x + m - 1) // m * m


def _next_pow2(x):
    return 1 if x <= 1 else 1 << (x - 1).bit_length()


# ----------------------------------------------------------------------------
# Constant construction (matches torchaudio semantics)
# ----------------------------------------------------------------------------
def _hann_window(win_size, n_fft):
    n = np.arange(win_size, dtype=np.float64)
    w = 0.5 - 0.5 * np.cos(2.0 * np.pi * n / win_size)   # periodic hann
    left = (n_fft - win_size) // 2
    out = np.zeros((n_fft,), dtype=np.float64)
    out[left:left + win_size] = w
    return out.astype(np.float32)


def _dft_mats(n_fft):
    n_freqs = n_fft // 2 + 1
    n = np.arange(n_fft, dtype=np.float64)[:, None]
    k = np.arange(n_freqs, dtype=np.float64)[None, :]
    ang = 2.0 * np.pi * n * k / n_fft
    return np.cos(ang).astype(np.float32), np.sin(ang).astype(np.float32)


def _linear_fbanks(n_freqs, f_min, f_max, n_filter, sample_rate):
    all_freqs = np.linspace(0.0, sample_rate // 2, n_freqs)
    f_pts = np.linspace(f_min, f_max, n_filter + 2)
    f_diff = f_pts[1:] - f_pts[:-1]
    slopes = f_pts[None, :] - all_freqs[:, None]
    down = (-1.0 * slopes[:, :-2]) / f_diff[:-1]
    up = slopes[:, 2:] / f_diff[1:]
    fb = np.maximum(0.0, np.minimum(down, up))
    return fb.astype(np.float32)                          # (n_freqs, n_filter)


def _create_dct(n_lfcc, n_filter):
    n = np.arange(n_filter, dtype=np.float64)
    k = np.arange(n_lfcc, dtype=np.float64)[:, None]
    dct = np.cos(np.pi / n_filter * (n + 0.5) * k)        # (n_lfcc, n_filter)
    dct[0] *= 1.0 / math.sqrt(2.0)
    dct *= math.sqrt(2.0 / n_filter)
    return dct.astype(np.float32)                         # (n_lfcc, n_filter)


# ----------------------------------------------------------------------------
# Wrapper
# ----------------------------------------------------------------------------
def lfcc_forward(audio, labels, *, fs, n_fft, hop_size, win_size,
                 n_filters, n_lfcc, center=True, max_tile_frames=512):
    audio = audio.astype(jnp.float32)
    labels = labels.astype(jnp.float32)
    n_freqs = n_fft // 2 + 1
    two_nf_pad = _round_up(2 * n_freqs, 128)              # lane-aligned [re|im] width

    # In-kernel framing fast path requires hop | n_fft.
    # TODO(synk): general hop (hop does not divide n_fft) needs a gcd-chunked
    # strided variant of the in-kernel framing; fall back to host framing there.
    assert n_fft % hop_size == 0, "fast path requires hop_size to divide n_fft"
    R = n_fft // hop_size

    # ---- framing geometry ----------------------------------------------------
    if center:
        pad = n_fft // 2
        audio_p = jnp.pad(audio, (pad, pad), mode="reflect")
    else:
        audio_p = audio
    L_p = audio_p.shape[0]
    num_frames = (L_p - n_fft) // hop_size + 1

    # tile_f must be a multiple of 128 (frames ride the lane axis of the
    # transposed LFCC output).  Aim for >=2 tiles whenever num_frames > 128 so
    # the "parallel" frame axis shards across v7x's two TensorCores; on v6e
    # (128 MiB VMEM) max_tile_frames can be raised to 1024 for long audio.
    tile_f = _round_up(pl.cdiv(num_frames, 2), 128)
    tile_f = max(128, min(tile_f, _round_up(max_tile_frames, 128)))
    num_tiles = pl.cdiv(num_frames, tile_f)
    f_pad = num_tiles * tile_f

    # Overlap rows fetched from the next tile (second BlockSpec on the same array).
    tail = max(8, _next_pow2(R - 1))
    assert tile_f % tail == 0, "n_fft/hop_size too large for this frame tile"

    # Hop-chunked audio: A[c, h] = audio_p[c*hop + h].  frame[f, r*hop + h] is
    # A[f + r, h], so frames@basis decomposes into R hop-strided sub-matmuls and
    # the HBM input stream is just the raw audio (no n_fft/hop-fold duplication).
    total = (f_pad + tail) * hop_size
    audio_p = jnp.pad(audio_p, (0, max(0, total - L_p)))[:total]
    a_chunks = audio_p.reshape(f_pad + tail, hop_size)

    # ---- constants: window-folded [cos|-sin] basis, stacked FB, padded DCT ----
    window = _hann_window(win_size, n_fft)                 # (n_fft,)
    cos_m, sin_m = _dft_mats(n_fft)                        # (n_fft, n_freqs)
    basis_np = np.zeros((n_fft, two_nf_pad), np.float32)
    basis_np[:, :n_freqs] = window[:, None] * cos_m
    basis_np[:, n_freqs:2 * n_freqs] = window[:, None] * (-sin_m)

    fb = _linear_fbanks(n_freqs, 0.0, fs / 2.0, n_filters, fs)   # (n_freqs, n_filt)
    fb2_np = np.zeros((two_nf_pad, _FB_PAD), np.float32)
    fb2_np[:n_freqs, :n_filters] = fb
    fb2_np[n_freqs:2 * n_freqs, :n_filters] = fb

    lfcc_sub = _round_up(n_lfcc, 8)
    dct_np = _create_dct(n_lfcc, n_filters)                # (n_lfcc, n_filt)
    dctT_np = np.zeros((lfcc_sub, _FB_PAD), np.float32)
    dctT_np[:n_lfcc, :n_filters] = dct_np

    basis = jnp.asarray(basis_np)
    fb2 = jnp.asarray(fb2_np)
    dct_t = jnp.asarray(dctT_np)

    cparams = pltpu.CompilerParams(
        dimension_semantics=("parallel",),
        vmem_limit_bytes=48 * 1024 * 1024,
    )
    # NOTE: for large n_fft configs on v7x (64 MiB VMEM), additionally set
    # pipeline_mode=pl.Buffered(1) on the constant operands (basis/fb2/dct).

    # ---- pass 1: in-kernel framing + windowed DFT + power + FB + dB + tile max
    def db_kernel(a_main_ref, a_tail_ref, basis_ref, fb2_ref, db_ref, max_ref):
        a_full = jnp.concatenate([a_main_ref[...], a_tail_ref[...]], axis=0)
        spec = jnp.zeros((tile_f, two_nf_pad), jnp.float32)
        for r in range(R):                                  # unrolled, R small
            spec = spec + jnp.dot(
                a_full[r:r + tile_f, :],
                basis_ref[r * hop_size:(r + 1) * hop_size, :],
                preferred_element_type=jnp.float32)
        sq = spec * spec                                    # [re^2 | im^2 | 0]
        filt = jnp.dot(sq, fb2_ref[...], preferred_element_type=jnp.float32)
        db = _DB_SCALE * jnp.log(jnp.maximum(filt, _AMIN))  # 10*log10(power)
        # per-tile max over the valid (real frame, real filter) region only
        f0 = pl.program_id(0) * tile_f
        row = lax.broadcasted_iota(jnp.int32, (tile_f, _FB_PAD), 0) + f0
        col = lax.broadcasted_iota(jnp.int32, (tile_f, _FB_PAD), 1)
        valid = (row < num_frames) & (col < n_filters)
        tile_max = jnp.max(jnp.where(valid, db, _NEG_BIG))
        max_ref[...] = jnp.broadcast_to(tile_max, (8, 128)).astype(jnp.float32)
        db_ref[...] = db.astype(db_ref.dtype)               # bf16 intermediate

    db_full, tile_maxes = pl.pallas_call(
        db_kernel,
        out_shape=(jax.ShapeDtypeStruct((f_pad, _FB_PAD), jnp.bfloat16),
                   jax.ShapeDtypeStruct((num_tiles * 8, 128), jnp.float32)),
        grid=(num_tiles,),
        in_specs=[
            pl.BlockSpec((tile_f, hop_size), lambda i: (i, 0)),          # A main
            pl.BlockSpec((tail, hop_size),
                         lambda i: ((i + 1) * (tile_f // tail), 0)),     # A overlap
            pl.BlockSpec((n_fft, two_nf_pad), lambda i: (0, 0)),         # basis
            pl.BlockSpec((two_nf_pad, _FB_PAD), lambda i: (0, 0)),       # stacked FB
        ],
        out_specs=(pl.BlockSpec((tile_f, _FB_PAD), lambda i: (i, 0)),
                   pl.BlockSpec((8, 128), lambda i: (i, 0))),
        compiler_params=cparams,
    )(a_chunks, a_chunks, basis, fb2)

    # global top_db threshold from the tiny per-tile max vector (no re-read of db_full)
    thr = (jnp.max(tile_maxes) - _TOP_DB).reshape((1,)).astype(jnp.float32)

    # ---- pass 2: clamp + DCT, output already transposed (n_lfcc_pad, frames) --
    def lfcc_kernel(thr_ref, db_ref, dct_ref, out_ref):
        db = jnp.maximum(db_ref[...].astype(jnp.float32), thr_ref[0])
        # contract the filter (lane) axes of both operands -> (lfcc_sub, tile_f)
        out_ref[...] = lax.dot_general(
            dct_ref[...], db,
            dimension_numbers=(((1,), (1,)), ((), ())),
            preferred_element_type=jnp.float32)

    lfcc_full = pl.pallas_call(
        lfcc_kernel,
        out_shape=jax.ShapeDtypeStruct((lfcc_sub, f_pad), jnp.float32),
        grid=(num_tiles,),
        in_specs=[
            pl.BlockSpec(memory_space=pltpu.MemorySpace.SMEM),           # threshold
            pl.BlockSpec((tile_f, _FB_PAD), lambda i: (i, 0)),           # dB tile
            pl.BlockSpec((lfcc_sub, _FB_PAD), lambda i: (0, 0)),         # DCT^T
        ],
        out_specs=pl.BlockSpec((lfcc_sub, tile_f), lambda i: (0, i)),
        compiler_params=cparams,
    )(thr, db_full, dct_t)

    lfcc_tensor = lfcc_full[:n_lfcc, :num_frames]          # (n_lfcc, F), no transpose

    # ---- label alignment (glue + trivial mem-bound mean, left to XLA) ---------
    L = labels.shape[0]
    total_len = math.ceil(L / hop_size) * hop_size
    pad_len = total_len - L
    right = pad_len // 2
    left = right + (pad_len % 2)
    left_pad = jnp.full((left,), labels[0], dtype=jnp.float32)
    right_pad = jnp.full((right,), labels[-1], dtype=jnp.float32)
    labels_p = jnp.concatenate([left_pad, labels, right_pad])
    num_lbl_frames = (labels_p.shape[0] - win_size) // hop_size + 1
    lidx = (np.arange(num_lbl_frames)[:, None] * hop_size
            + np.arange(win_size)[None, :])
    framed_labels = labels_p[lidx].mean(axis=-1)           # (Fl,)

    return lfcc_tensor, framed_labels


# ----------------------------------------------------------------------------
# Main
# ----------------------------------------------------------------------------
if __name__ == "__main__":
    # small LFCC config: fs=16kHz, n_fft=win=64, hop=16, 20 filters, 10 coeffs
    FS, N_FFT, HOP, WIN, N_FILT, N_LFCC = 16000, 64, 16, 64, 20, 10
    N_SAMPLES = 250

    key = jax.random.PRNGKey(0)
    k_audio, k_labels = jax.random.split(key)
    audio = jax.random.normal(k_audio, (N_SAMPLES,), dtype=jnp.float32)
    labels = jax.random.uniform(k_labels, (N_SAMPLES,), dtype=jnp.float32)

    fwd = functools.partial(lfcc_forward, fs=FS, n_fft=N_FFT, hop_size=HOP,
                            win_size=WIN, n_filters=N_FILT, n_lfcc=N_LFCC,
                            center=True)
    lfcc_out, framed_labels = fwd(audio, labels)
    jax.block_until_ready(lfcc_out)
    jax.block_until_ready(framed_labels)

    expected_frames = 1 + N_SAMPLES // HOP
    expected_lbl_frames = (math.ceil(N_SAMPLES / HOP) * HOP - WIN) // HOP + 1
    assert lfcc_out.shape == (N_LFCC, expected_frames), lfcc_out.shape
    assert framed_labels.shape == (expected_lbl_frames,), framed_labels.shape
    assert bool(jnp.all(jnp.isfinite(lfcc_out)))
    assert bool(jnp.all(jnp.isfinite(framed_labels)))

    print("KERNEL_OK")
</pallas_src>

<mosaic_0001>
module attributes {stable_mosaic.version = 11 : i64} {
  func.func @db_kernel(%arg0: i32, %arg1: memref<128x16xf32, #tpu.memory_space<vmem>>, %arg2: memref<8x16xf32, #tpu.memory_space<vmem>>, %arg3: memref<64x128xf32, #tpu.memory_space<vmem>>, %arg4: memref<128x128xf32, #tpu.memory_space<vmem>>, %arg5: memref<128x128xbf16, #tpu.memory_space<vmem>>, %arg6: memref<8x128xf32, #tpu.memory_space<vmem>>) attributes {dimension_semantics = [#tpu.dimension_semantics<parallel>], iteration_bounds = array<i64: 1>, scalar_prefetch = 0 : i64, scratch_operands = 0 : i64, tpu.core_type = #tpu.core_type<tc>, window_params = [{transform_indices = @transform_0, window_bounds = array<i64: 128, 16>}, {transform_indices = @transform_1, window_bounds = array<i64: 8, 16>}, {pipeline_mode = #tpu.pipeline_mode<synchronous>, transform_indices = @transform_2, window_bounds = array<i64: 64, 128>}, {pipeline_mode = #tpu.pipeline_mode<synchronous>, transform_indices = @transform_3, window_bounds = array<i64: 128, 128>}, {transform_indices = @transform_4, window_bounds = array<i64: 128, 128>}, {transform_indices = @transform_5, window_bounds = array<i64: 8, 128>}]} {
    %c0 = arith.constant 0 : index
    %c0_0 = arith.constant 0 : index
    %0 = vector.load %arg1[%c0, %c0_0] : memref<128x16xf32, #tpu.memory_space<vmem>>, vector<128x16xf32>
    %c0_1 = arith.constant 0 : index
    %c0_2 = arith.constant 0 : index
    %1 = vector.load %arg2[%c0_1, %c0_2] : memref<8x16xf32, #tpu.memory_space<vmem>>, vector<8x16xf32>
    %2 = tpu.concatenate %0, %1 in 0 : vector<128x16xf32>, vector<8x16xf32> -> vector<136x16xf32>
    %cst = arith.constant 0.000000e+00 : f32
    %3 = vector.broadcast %cst : f32 to vector<128x128xf32>
    %4 = vector.extract_strided_slice %2 {offsets = [0, 0], sizes = [128, 16], strides = [1, 1]} : vector<136x16xf32> to vector<128x16xf32>
    %c0_3 = arith.constant 0 : index
    %c0_4 = arith.constant 0 : index
    %5 = vector.load %arg3[%c0_3, %c0_4] : memref<64x128xf32, #tpu.memory_space<vmem>>, vector<16x128xf32>
    %cst_5 = arith.constant dense<0.000000e+00> : vector<128x128xf32>
    %6 = tpu.matmul %4, %5, %cst_5 {dimension_numbers = #tpu.dot_dimension_numbers<[1], [0], [0], [1], [0, 0, 1, 1], [], []>} : vector<128x16xf32>, vector<16x128xf32>, vector<128x128xf32> -> vector<128x128xf32>
    %7 = arith.addf %3, %6 : vector<128x128xf32>
    %8 = vector.extract_strided_slice %2 {offsets = [1, 0], sizes = [128, 16], strides = [1, 1]} : vector<136x16xf32> to vector<128x16xf32>
    %c16 = arith.constant 16 : index
    %c0_6 = arith.constant 0 : index
    %9 = vector.load %arg3[%c16, %c0_6] : memref<64x128xf32, #tpu.memory_space<vmem>>, vector<16x128xf32>
    %cst_7 = arith.constant dense<0.000000e+00> : vector<128x128xf32>
    %10 = tpu.matmul %8, %9, %cst_7 {dimension_numbers = #tpu.dot_dimension_numbers<[1], [0], [0], [1], [0, 0, 1, 1], [], []>} : vector<128x16xf32>, vector<16x128xf32>, vector<128x128xf32> -> vector<128x128xf32>
    %11 = arith.addf %7, %10 : vector<128x128xf32>
    %12 = vector.extract_strided_slice %2 {offsets = [2, 0], sizes = [128, 16], strides = [1, 1]} : vector<136x16xf32> to vector<128x16xf32>
    %c32 = arith.constant 32 : index
    %c0_8 = arith.constant 0 : index
    %13 = vector.load %arg3[%c32, %c0_8] : memref<64x128xf32, #tpu.memory_space<vmem>>, vector<16x128xf32>
    %cst_9 = arith.constant dense<0.000000e+00> : vector<128x128xf32>
    %14 = tpu.matmul %12, %13, %cst_9 {dimension_numbers = #tpu.dot_dimension_numbers<[1], [0], [0], [1], [0, 0, 1, 1], [], []>} : vector<128x16xf32>, vector<16x128xf32>, vector<128x128xf32> -> vector<128x128xf32>
    %15 = arith.addf %11, %14 : vector<128x128xf32>
    %16 = vector.extract_strided_slice %2 {offsets = [3, 0], sizes = [128, 16], strides = [1, 1]} : vector<136x16xf32> to vector<128x16xf32>
    %c48 = arith.constant 48 : index
    %c0_10 = arith.constant 0 : index
    %17 = vector.load %arg3[%c48, %c0_10] : memref<64x128xf32, #tpu.memory_space<vmem>>, vector<16x128xf32>
    %cst_11 = arith.constant dense<0.000000e+00> : vector<128x128xf32>
    %18 = tpu.matmul %16, %17, %cst_11 {dimension_numbers = #tpu.dot_dimension_numbers<[1], [0], [0], [1], [0, 0, 1, 1], [], []>} : vector<128x16xf32>, vector<16x128xf32>, vector<128x128xf32> -> vector<128x128xf32>
    %19 = arith.addf %15, %18 : vector<128x128xf32>
    %20 = arith.mulf %19, %19 : vector<128x128xf32>
    %c0_12 = arith.constant 0 : index
    %c0_13 = arith.constant 0 : index
    %21 = vector.load %arg4[%c0_12, %c0_13] : memref<128x128xf32, #tpu.memory_space<vmem>>, vector<128x128xf32>
    %cst_14 = arith.constant dense<0.000000e+00> : vector<128x128xf32>
    %22 = tpu.matmul %20, %21, %cst_14 {dimension_numbers = #tpu.dot_dimension_numbers<[1], [0], [0], [1], [0, 0, 1, 1], [], []>} : vector<128x128xf32>, vector<128x128xf32>, vector<128x128xf32> -> vector<128x128xf32>
    %cst_15 = arith.constant 1.000000e-10 : f32
    %23 = vector.broadcast %cst_15 : f32 to vector<128x128xf32>
    %24 = arith.maximumf %22, %23 : vector<128x128xf32>
    %25 = math.log %24 : vector<128x128xf32>
    %cst_16 = arith.constant 4.34294462 : f32
    %26 = vector.broadcast %cst_16 : f32 to vector<128x128xf32>
    %27 = arith.mulf %26, %25 : vector<128x128xf32>
    %c128_i32 = arith.constant 128 : i32
    %28 = arith.muli %arg0, %c128_i32 : i32
    %29 = tpu.iota {dimensions = array<i32: 0>} : vector<128x128xi32>
    %30 = vector.broadcast %28 : i32 to vector<128x128xi32>
    %31 = arith.addi %29, %30 : vector<128x128xi32>
    %32 = tpu.iota {dimensions = array<i32: 1>} : vector<128x128xi32>
    %c16_i32 = arith.constant 16 : i32
    %33 = vector.broadcast %c16_i32 : i32 to vector<128x128xi32>
    %34 = arith.cmpi slt, %31, %33 : vector<128x128xi32>
    %c20_i32 = arith.constant 20 : i32
    %35 = vector.broadcast %c20_i32 : i32 to vector<128x128xi32>
    %36 = arith.cmpi slt, %32, %35 : vector<128x128xi32>
    %37 = arith.andi %34, %36 : vector<128x128xi1>
    %cst_17 = arith.constant -1.000000e+30 : f32
    %38 = vector.broadcast %cst_17 : f32 to vector<128x128xf32>
    %39 = arith.select %37, %27, %38 : vector<128x128xi1>, vector<128x128xf32>
    %40 = vector.shape_cast %39 : vector<128x128xf32> to vector<1x128x128xf32>
    %cst_18 = arith.constant dense<0xFF800000> : vector<1xf32>
    %41 = vector.multi_reduction <maximumf>, %40, %cst_18 [1, 2] : vector<1x128x128xf32> to vector<1xf32>
    %42 = vector.shape_cast %41 : vector<1xf32> to vector<1x1x1xf32>
    %43 = vector.extract %42[0, 0, 0] : f32 from vector<1x1x1xf32>
    %44 = vector.broadcast %43 : f32 to vector<8x128xf32>
    %c0_19 = arith.constant 0 : index
    %c0_20 = arith.constant 0 : index
    %45 = vector.load %arg6[%c0_19, %c0_20] : memref<8x128xf32, #tpu.memory_space<vmem>>, vector<8x128xf32>
    tpu.vector_store %arg6[%c0_19, %c0_20], %44 {strides = array<i32>} : memref<8x128xf32, #tpu.memory_space<vmem>>, vector<8x128xf32>,
    %46 = arith.truncf %27 : vector<128x128xf32> to vector<128x128xbf16>
    %c0_21 = arith.constant 0 : index
    %c0_22 = arith.constant 0 : index
    %47 = vector.load %arg5[%c0_21, %c0_22] : memref<128x128xbf16, #tpu.memory_space<vmem>>, vector<128x128xbf16>
    tpu.vector_store %arg5[%c0_21, %c0_22], %46 {strides = array<i32>} : memref<128x128xbf16, #tpu.memory_space<vmem>>, vector<128x128xbf16>,
    return
  }
  func.func @transform_0(%arg0: i32) -> (i32, i32) {
    %c0_i32 = arith.constant 0 : i32
    %c0_i32_0 = arith.constant 0 : i32
    return %arg0, %c0_i32 : i32, i32
  }
  func.func @transform_1(%arg0: i32) -> (i32, i32) {
    %c1_i32 = arith.constant 1 : i32
    %0 = arith.addi %arg0, %c1_i32 : i32
    %c16_i32 = arith.constant 16 : i32
    %1 = arith.muli %0, %c16_i32 : i32
    %c0_i32 = arith.constant 0 : i32
    %c0_i32_0 = arith.constant 0 : i32
    return %1, %c0_i32 : i32, i32
  }
  func.func @transform_2(%arg0: i32) -> (i32, i32) {
    %c0_i32 = arith.constant 0 : i32
    %c0_i32_0 = arith.constant 0 : i32
    %c0_i32_1 = arith.constant 0 : i32
    return %c0_i32, %c0_i32_0 : i32, i32
  }
  func.func @transform_3(%arg0: i32) -> (i32, i32) {
    %c0_i32 = arith.constant 0 : i32
    %c0_i32_0 = arith.constant 0 : i32
    %c0_i32_1 = arith.constant 0 : i32
    return %c0_i32, %c0_i32_0 : i32, i32
  }
  func.func @transform_4(%arg0: i32) -> (i32, i32) {
    %c0_i32 = arith.constant 0 : i32
    %c0_i32_0 = arith.constant 0 : i32
    return %arg0, %c0_i32 : i32, i32
  }
  func.func @transform_5(%arg0: i32) -> (i32, i32) {
    %c0_i32 = arith.constant 0 : i32
    %c0_i32_0 = arith.constant 0 : i32
    return %arg0, %c0_i32 : i32, i32
  }
}

</mosaic_0001>

<bundles_post_ra>
// kernel: tpu_custom_call.1
= control target key start
LH: loop header
LB: loop body
LE: loop exit
PB: predicated region body
PF: predicated region fallthrough
CT: control target
= control target key end

     0   :  { %11 = vsyncpa [#allocation3], 0  ;;  %vm115_vm0 = vcmask 130048   ;;  %vm81_vm1 = vcmask 1046528   ;;  %s2393_s0 = inlined_call_operand.vmem [shape: f32[136,16], index: 0, kind: input, shape index: {}]   ;;  %s2394_s1 = inlined_call_operand.vmem [shape: f32[136,16], index: 1, kind: input, shape index: {}]   ;;  %s2395_s2 = inlined_call_operand.vmem [shape: f32[64,128], index: 2, kind: input, shape index: {}]   ;;  %s2396_s3 = inlined_call_operand.vmem [shape: f32[128,128], index: 3, kind: input, shape index: {}]   ;;  %s2397_s4 = inlined_call_operand.hbm [shape: bf16[128,128], index: 4, kind: output, shape index: {0}]   ;;  %s2398_s5 = inlined_call_operand.hbm [shape: f32[8,128], index: 5, kind: output, shape index: {1}]  }
   0x1   :  { %v60_v0 = vld [vmem:[%s2395_s2] sm:$0xff]  ;;  %v61_v1 = vld [vmem:[%s2395_s2 + $0x8] sm:$0xff]  ;;  %v2056_v8 = vld [vmem:[%s2393_s0 + $0x10] sm:$0xff] }
   0x2   :  { %v2038_v2 = vld [vmem:[%s2393_s0] sm:$0xff]  ;;  %v1817_v3 = vpack.c.bf16 %v61_v1, %v60_v0  ;;  %v471_v5 = vld [vmem:[%s2395_s2 + $0x28] sm:$0xff]  ;;  %v2065_v9 = vld [vmem:[%s2393_s0 + $0x18] sm:$0xff]  ;;  %v85_v20 = vrot.slane %v2056_v8, 1 }
   0x3   :  { %1677 = vmatprep.mubr.msk.f32.mxu0 %vm115_vm0, %v2038_v2  ;;  %v470_v4 = vld [vmem:[%s2395_s2 + $0x20] sm:$0xff]  ;;  %v2051_v7 = vld [vmem:[%s2393_s0 + $0x8] sm:$0xff]  ;;  %v699_v11 = vld [vmem:[%s2395_s2 + $0x30] sm:$0xff]  ;;  %v82_v18 = vrot.slane %v2038_v2, 1 }
   0x4   :  { %v1821_v6 = vpack.c.bf16 %v471_v5, %v470_v4  ;;  %1818 = vmatprep.subr.bf16.mxu0 %v1817_v3  ;;  %v2070_v10 = vld [vmem:[%s2393_s0 + $0x20] sm:$0xff]  ;;  %v700_v12 = vld [vmem:[%s2395_s2 + $0x38] sm:$0xff]  ;;  %v2085_v13 = vld [vmem:[%s2393_s0 + $0x28] sm:$0xff]  ;;  %v83_v19 = vrot.slane %v2051_v7, 1 }
   0x5   :  { %1820 = vmatpush3.bf16.msra.mxu0 %v1817_v3  ;;  %v2090_v14 = vld [vmem:[%s2393_s0 + $0x30] sm:$0xff]  ;;  %v2092_v15 = vpack.c.bf16 %v700_v12, %v699_v11  ;;  %v63_v17 = vld [vmem:[%s2395_s2 + $0x18] sm:$0xff] }
   0x6   :  { %1822 = vmatprep.subr.bf16.mxu0 %v1821_v6  ;;  %v62_v16 = vld [vmem:[%s2395_s2 + $0x10] sm:$0xff]  ;;  %v2110_v21 = vld [vmem:[%s2393_s0 + $0x38] sm:$0xff] }
   0x8   :  { %1678 = vmatmul.mubr.msk.f32.vlgmr.msra.gmra.mrb[0].mxu0 %vm115_vm0, %v2051_v7 }
   0x9   :  { %1824 = vmatpush3.bf16.msra.mxu0 %v1821_v6  ;;  %1680 = vmatprep.mubr.msk.f32.mxu0 %vm115_vm0, %v2056_v8 }
   0xa   :  { %1826 = vmatprep.subr.bf16.mxu0 %v2092_v15 }
   0xc   :  { %1681 = vmatmul.mubr.msk.f32.gmra.mrb[2].mxu0 %vm115_vm0, %v2065_v9 }
   0xd   :  { %1683 = vmatprep.mubr.msk.f32.mxu0 %vm115_vm0, %v2070_v10 }
  0x10   :  { %1684 = vmatmul.mubr.msk.f32.gmra.mrb[4].mxu0 %vm115_vm0, %v2085_v13 }
  0x11   :  { %1686 = vmatprep.mubr.msk.f32.mxu0 %vm115_vm0, %v2090_v14 }
  0x12   :  { %12 = vsyncpa [#allocation5], 0  ;;  %v87_v22 = vrot.slane %v2065_v9, 1  ;;  %v2117_v23 = vld [vmem:[%s2393_s0 + $0x40] sm:$0xff]  ;;  %v1813_v24 = vpack.c.bf16 %v63_v17, %v62_v16  ;;  %v84_v25 = vsel %vm81_vm1, %v82_v18, %v83_v19  ;;  %v89_v26 = vrot.slane %v2070_v10, 1  ;;  %v2128_v27 = vld [vmem:[%s2393_s0 + $0x48] sm:$0xff] }
  0x13   :  { %v86_v28 = vsel %vm81_vm1, %v83_v19, %v85_v20  ;;  %v91_v29 = vrot.slane %v2085_v13, 1  ;;  %v2135_v30 = vld [vmem:[%s2393_s0 + $0x50] sm:$0xff]  ;;  %1649 = vmatprep.mubr.msk.f32.mxu1 %vm115_vm0, %v84_v25  ;;  %v93_v32 = vrot.slane %v2090_v14, 1  ;;  %v2148_v33 = vld [vmem:[%s2393_s0 + $0x58] sm:$0xff]  ;;  %v944_v35 = vld [vmem:[%s2396_s3] sm:$0xff]  ;;  %v95_v37 = vrot.slane %v2110_v21, 1 }
  0x14   :  { %1687 = vmatmul.mubr.msk.f32.gmra.mrb[6].mxu0 %vm115_vm0, %v2110_v21  ;;  %1814 = vmatprep.subr.bf16.mxu1 %v1813_v24  ;;  %v88_v31 = vsel %vm81_vm1, %v85_v20, %v87_v22  ;;  %v90_v34 = vsel %vm81_vm1, %v87_v22, %v89_v26  ;;  %v945_v36 = vld [vmem:[%s2396_s3 + $0x8] sm:$0xff]  ;;  %v2162_v38 = vld [vmem:[%s2393_s0 + $0x60] sm:$0xff]  ;;  %v946_v40 = vld [vmem:[%s2396_s3 + $0x10] sm:$0xff]  ;;  %v473_v43 = vrot.slane %v2038_v2, 2  ;;  %v97_v44 = vrot.slane %v2117_v23, 1 }
  0x15   :  { %1689 = vmatprep.mubr.msk.f32.mxu0 %vm115_vm0, %v2117_v23  ;;  %1816 = vmatpush3.bf16.msra.mxu1 %v1813_v24  ;;  %v92_v39 = vsel %vm81_vm1, %v89_v26, %v91_v29  ;;  %v947_v41 = vld [vmem:[%s2396_s3 + $0x18] sm:$0xff]  ;;  %v1829_v42 = vpack.c.bf16 %v945_v36, %v944_v35  ;;  %v2181_v45 = vld [vmem:[%s2393_s0 + $0x68] sm:$0xff]  ;;  %v94_v46 = vsel %vm81_vm1, %v91_v29, %v93_v32  ;;  %v474_v47 = vrot.slane %v2051_v7, 2  ;;  %v2190_v49 = vld [vmem:[%s2393_s0 + $0x70] sm:$0xff] }
  0x16   :  { %v99_v48 = vrot.slane %v2128_v27, 1  ;;  %v96_v50 = vsel %vm81_vm1, %v93_v32, %v95_v37  ;;  %v1833_v51 = vpack.c.bf16 %v947_v41, %v946_v40  ;;  %vm472_vm2 = vcmask 1045504   ;;  %v948_v52 = vld [vmem:[%s2396_s3 + $0x20] sm:$0xff]  ;;  %v949_v53 = vld [vmem:[%s2396_s3 + $0x28] sm:$0xff]  ;;  %v2209_v56 = vld [vmem:[%s2393_s0 + $0x78] sm:$0xff] }
  0x17   :  { %1830 = vmatprep.subr.bf16.mxu1 %v1829_v42  ;;  %v476_v54 = vrot.slane %v2056_v8, 2  ;;  %v101_v55 = vrot.slane %v2135_v30, 1  ;;  %v98_v57 = vsel %vm81_vm1, %v95_v37, %v97_v44  ;;  %v478_v58 = vrot.slane %v2065_v9, 2  ;;  %v950_v63 = vld [vmem:[%s2396_s3 + $0x30] sm:$0xff]  ;;  %v951_v0 = vld [vmem:[%s2396_s3 + $0x38] sm:$0xff]  ;;  %v952_v18 = vld [vmem:[%s2396_s3 + $0x40] sm:$0xff] }
  0x18   :  { %1690 = vmatmul.mubr.msk.f32.gmra.mrb[8].mxu0 %vm115_vm0, %v2128_v27  ;;  %1650 = vmatmul.mubr.msk.f32.vlgmr.msra.gmra.mrb[0].mxu1 %vm115_vm0, %v86_v28  ;;  %v475_v59 = vsel %vm472_vm2, %v473_v43, %v474_v47  ;;  %v100_v60 = vsel %vm81_vm1, %v97_v44, %v99_v48  ;;  %v1837_v61 = vpack.c.bf16 %v949_v53, %v948_v52  ;;  %v103_v62 = vrot.slane %v2148_v33, 1  ;;  %v953_v19 = vld [vmem:[%s2396_s3 + $0x48] sm:$0xff]  ;;  %v2265_v35 = vld [vmem:[%s2394_s1 + $0x80] sm:$0xff] }
  0x19   :  { %1692 = vmatprep.mubr.msk.f32.mxu0 %vm115_vm0, %v2135_v30  ;;  %1652 = vmatprep.mubr.msk.f32.mxu1 %vm115_vm0, %v88_v31  ;;  %v480_v1 = vrot.slane %v2070_v10, 2  ;;  %v105_v3 = vrot.slane %v2162_v38, 1  ;;  %v477_v4 = vsel %vm472_vm2, %v474_v47, %v476_v54  ;;  %v102_v5 = vsel %vm81_vm1, %v99_v48, %v101_v55  ;;  %v957_v47 = vld [vmem:[%s2396_s3 + $0x68] sm:$0xff] }
  0x1a   :  { %1832 = vmatpush3.bf16.msra.mxu1 %v1829_v42  ;;  %v482_v6 = vrot.slane %v2085_v13, 2  ;;  %v107_v11 = vrot.slane %v2181_v45, 1  ;;  %v479_v12 = vsel %vm472_vm2, %v476_v54, %v478_v58  ;;  %v1841_v16 = vpack.c.bf16 %v951_v0, %v950_v63 }
  0x1b   :  { %1834 = vmatprep.subr.bf16.mxu1 %v1833_v51  ;;  %v104_v17 = vsel %vm81_vm1, %v101_v55, %v103_v62  ;;  %v484_v20 = vrot.slane %v2090_v14, 2  ;;  %v486_v22 = vrot.slane %v2110_v21, 2  ;;  %v109_v24 = vrot.slane %v2190_v49, 1 }
  0x1c   :  { %1693 = vmatmul.mubr.msk.f32.gmra.mrb[10].mxu0 %vm115_vm0, %v2148_v33  ;;  %1653 = vmatmul.mubr.msk.f32.gmra.mrb[2].mxu1 %vm115_vm0, %v90_v34  ;;  %v481_v25 = vsel %vm472_vm2, %v478_v58, %v480_v1  ;;  %v106_v26 = vsel %vm81_vm1, %v103_v62, %v105_v3  ;;  %v111_v28 = vrot.slane %v2209_v56, 1  ;;  %v483_v29 = vsel %vm472_vm2, %v480_v1, %v482_v6  ;;  %v955_v34 = vld [vmem:[%s2396_s3 + $0x58] sm:$0xff] }
  0x1d   :  { %1695 = vmatprep.mubr.msk.f32.mxu0 %vm115_vm0, %v2162_v38  ;;  %1655 = vmatprep.mubr.msk.f32.mxu1 %vm115_vm0, %v92_v39  ;;  %v108_v31 = vsel %vm81_vm1, %v105_v3, %v107_v11  ;;  %v1845_v32 = vpack.c.bf16 %v953_v19, %v952_v18  ;;  %v488_v36 = vrot.slane %v2117_v23, 2  ;;  %v485_v37 = vsel %vm472_vm2, %v482_v6, %v484_v20 }
  0x1e   :  { %1836 = vmatpush3.bf16.msra.mxu1 %v1833_v51  ;;  %v110_v39 = vsel %vm81_vm1, %v107_v11, %v109_v24  ;;  %v113_v40 = vrot.slane %v2265_v35, 1  ;;  %v490_v41 = vrot.slane %v2128_v27, 2  ;;  %v487_v42 = vsel %vm472_vm2, %v484_v20, %v486_v22 }
  0x1f   :  { %1838 = vmatprep.subr.bf16.mxu1 %v1837_v61  ;;  %v112_v43 = vsel %vm81_vm1, %v109_v24, %v111_v28  ;;  %v492_v48 = vrot.slane %v2135_v30, 2  ;;  %v494_v53 = vrot.slane %v2148_v33, 2  ;;  %v496_v55 = vrot.slane %v2162_v38, 2 }
  0x20   :  { %1696 = vmatmul.mubr.msk.f32.gmra.mrb[12].mxu0 %vm115_vm0, %v2181_v45  ;;  %1656 = vmatmul.mubr.msk.f32.gmra.mrb[4].mxu1 %vm115_vm0, %v94_v46  ;;  %v956_v46 = vld [vmem:[%s2396_s3 + $0x60] sm:$0xff]  ;;  %v114_v51 = vsel %vm81_vm1, %v111_v28, %v113_v40  ;;  %v491_v54 = vsel %vm472_vm2, %v488_v36, %v490_v41  ;;  %v498_v58 = vrot.slane %v2181_v45, 2  ;;  %v502_v62 = vrot.slane %v2209_v56, 2 }
  0x21   :  { %1698 = vmatprep.mubr.msk.f32.mxu0 %vm115_vm0, %v2190_v49  ;;  %1658 = vmatprep.mubr.msk.f32.mxu1 %vm115_vm0, %v96_v50  ;;  %v489_v50 = vsel %vm472_vm2, %v486_v22, %v488_v36  ;;  %v1853_v52 = vpack.c.bf16 %v957_v47, %v956_v46  ;;  %v504_v1 = vrot.slane %v2265_v35, 2  ;;  %v702_v3 = vrot.slane %v2038_v2, 3 }
  0x22   :  { %1840 = vmatpush3.bf16.msra.mxu1 %v1837_v61  ;;  %v497_v61 = vsel %vm472_vm2, %v494_v53, %v496_v55  ;;  %v499_v63 = vsel %vm472_vm2, %v496_v55, %v498_v58  ;;  %vm701_vm3 = vcmask 1044480   ;;  %v705_v6 = vrot.slane %v2056_v8, 3 }
  0x23   :  { %1842 = vmatprep.subr.bf16.mxu1 %v1841_v16  ;;  %v505_v11 = vsel %vm472_vm2, %v502_v62, %v504_v1  ;;  %v709_v2 = vrot.slane %v2070_v10, 3  ;;  %v713_v18 = vrot.slane %v2090_v14, 3  ;;  %v715_v19 = vrot.slane %v2110_v21, 3 }
  0x24   :  { %1699 = vmatmul.mubr.msk.f32.gmra.mrb[14].mxu0 %vm115_vm0, %v2209_v56  ;;  %1659 = vmatmul.mubr.msk.f32.gmra.mrb[6].mxu1 %vm115_vm0, %v98_v57  ;;  %v493_v57 = vsel %vm472_vm2, %v490_v41, %v492_v48  ;;  %v717_v20 = vrot.slane %v2117_v23, 3  ;;  %v719_v22 = vrot.slane %v2128_v27, 3  ;;  %v721_v24 = vrot.slane %v2135_v30, 3 }
  0x25   :  { %1705 = vmatprep.mubr.msk.f32.mxu0 %vm115_vm0, %v475_v59  ;;  %1661 = vmatprep.mubr.msk.f32.mxu1 %vm115_vm0, %v100_v60  ;;  %v495_v59 = vsel %vm472_vm2, %v492_v48, %v494_v53  ;;  %v500_v60 = vrot.slane %v2190_v49, 2  ;;  %v716_v14 = vsel %vm701_vm3, %v713_v18, %v715_v19  ;;  %v727_v28 = vrot.slane %v2181_v45, 3 }
  0x26   :  { %1844 = vmatpush3.bf16.msra.mxu1 %v1841_v16  ;;  %v718_v21 = vsel %vm701_vm3, %v715_v19, %v717_v20  ;;  %v720_v23 = vsel %vm701_vm3, %v717_v20, %v719_v22  ;;  %v722_v27 = vsel %vm701_vm3, %v719_v22, %v721_v24 }
  0x27   :  { %1846 = vmatprep.subr.bf16.mxu1 %v1845_v32  ;;  %v501_v0 = vsel %vm472_vm2, %v498_v58, %v500_v60 }
  0x28   :  { %1706 = vmatmul.mubr.msk.f32.vlgmr.msra.gmra.mrb[0].mxu0 %vm115_vm0, %v477_v4  ;;  %1662 = vmatmul.mubr.msk.f32.gmra.mrb[8].mxu1 %vm115_vm0, %v102_v5  ;;  %v703_v4 = vrot.slane %v2051_v7, 3  ;;  %v503_v5 = vsel %vm472_vm2, %v500_v60, %v502_v62 }
  0x29   :  { %1828 = vmatpush3.bf16.msra.mxu0 %v2092_v15  ;;  %1708 = vmatprep.mubr.msk.f32.mxu0 %vm115_vm0, %v479_v12  ;;  %v954_v15 = vld [vmem:[%s2396_s3 + $0x50] sm:$0xff]  ;;  %v707_v12 = vrot.slane %v2065_v9, 3 }
  0x2a   :  { %1664 = vmatprep.mubr.msk.f32.mxu1 %vm115_vm0, %v104_v17  ;;  %v1849_v44 = vpack.c.bf16 %v955_v34, %v954_v15  ;;  %1848 = vmatpush3.bf16.msra.mxu1 %v1845_v32  ;;  %v704_v16 = vsel %vm701_vm3, %v702_v3, %v703_v4  ;;  %v706_v7 = vsel %vm701_vm3, %v703_v4, %v705_v6  ;;  %v711_v17 = vrot.slane %v2085_v13, 3  ;;  %v959_v34 = vld [vmem:[%s2396_s3 + $0x78] sm:$0xff] }
  0x2b   :  { %v708_v8 = vsel %vm701_vm3, %v705_v6, %v707_v12  ;;  %v710_v9 = vsel %vm701_vm3, %v707_v12, %v709_v2  ;;  %v733_v32 = vrot.slane %v2265_v35, 3 }
  0x2c   :  { %1709 = vmatmul.mubr.msk.f32.gmra.mrb[2].mxu0 %vm115_vm0, %v481_v25  ;;  %1665 = vmatmul.mubr.msk.f32.gmra.mrb[10].mxu1 %vm115_vm0, %v106_v26  ;;  %v712_v10 = vsel %vm701_vm3, %v709_v2, %v711_v17  ;;  %v714_v13 = vsel %vm701_vm3, %v711_v17, %v713_v18  ;;  %v723_v25 = vrot.slane %v2148_v33, 3  ;;  %v725_v26 = vrot.slane %v2162_v38, 3 }
  0x2d   :  { %1711 = vmatprep.mubr.msk.f32.mxu0 %vm115_vm0, %v483_v29  ;;  %1667 = vmatprep.mubr.msk.f32.mxu1 %vm115_vm0, %v108_v31  ;;  %v729_v29 = vrot.slane %v2190_v49, 3  ;;  %v731_v31 = vrot.slane %v2209_v56, 3  ;;  %v958_v56 = vld [vmem:[%s2396_s3 + $0x70] sm:$0xff]  ;;  %s1995_s3 = smov [#allocation2]  }
  0x2e   :  { %1850 = vmatprep.subr.bf16.mxu1 %v1849_v44  ;;  %v724_v30 = vsel %vm701_vm3, %v721_v24, %v723_v25  ;;  %v726_v33 = vsel %vm701_vm3, %v723_v25, %v725_v26  ;;  %v728_v38 = vsel %vm701_vm3, %v725_v26, %v727_v28  ;;  %v1857_v36 = vpack.c.bf16 %v959_v34, %v958_v56  ;;  %s1366_s21 = sshll.u32 %s1995_s3, 4  ;;  %s1367_s21 = int_to_ptr.vmem [resolvable:$true] %s1366_s21 }
  0x2f   :  { %1852 = vmatpush3.bf16.msra.mxu1 %v1849_v44  ;;  %v730_v45 = vsel %vm701_vm3, %v727_v28, %v729_v29  ;;  %v732_v15 = vsel %vm701_vm3, %v729_v29, %v731_v31  ;;  %v734_v49 = vsel %vm701_vm3, %v731_v31, %v733_v32  ;;  %s1947_s22 = scalar_lea.vmem %s1367_s21, 1024  ;;  %p1952_p1 = scmp.lt.s32.totalorder %s1367_s21, %s1367_s21 }
  0x30   :  { %1712 = vmatmul.mubr.msk.f32.gmra.mrb[4].mxu0 %vm115_vm0, %v485_v37  ;;  %1668 = vmatmul.mubr.msk.f32.gmra.mrb[12].mxu1 %vm115_vm0, %v110_v39  ;;  %p1948_p0 = scmp.ne.s32.totalorder %s1367_s21, %s1947_s22  ;;  %p1953_p2 = scmp.lt.s32.totalorder %s1947_s22, %s1947_s22 }
  0x31   :  { %1714 = vmatprep.mubr.msk.f32.mxu0 %vm115_vm0, %v487_v42  ;;  %1670 = vmatprep.mubr.msk.f32.mxu1 %vm115_vm0, %v112_v43 }
  0x32   :  { %1854 = vmatprep.subr.bf16.mxu1 %v1853_v52  ;;  %p1954_p3 = por %p1953_p2, %p1952_p1 }
  0x33   :  { %1856 = vmatpush3.bf16.msra.mxu1 %v1853_v52 }
  0x34   :  { %1715 = vmatmul.mubr.msk.f32.gmra.mrb[6].mxu0 %vm115_vm0, %v489_v50  ;;  %1671 = vmatmul.mubr.msk.f32.gmra.mrb[14].mxu1 %vm115_vm0, %v114_v51  ;;  %p1955_p4 = pnand %p1954_p3, %p1948_p0 }
  0x35   :  { %1717 = vmatprep.mubr.msk.f32.mxu0 %vm115_vm0, %v491_v54  ;;  %1858 = vmatprep.subr.bf16.mxu1 %v1857_v36 }
  0x37   :  { %1860 = vmatpush3.bf16.msra.mxu1 %v1857_v36 }
  0x38   :  { %1718 = vmatmul.mubr.msk.f32.gmra.mrb[8].mxu0 %vm115_vm0, %v493_v57 }
  0x39   :  { %1720 = vmatprep.mubr.msk.f32.mxu0 %vm115_vm0, %v495_v59 }
  0x3c   :  { %1721 = vmatmul.mubr.msk.f32.gmra.mrb[10].mxu0 %vm115_vm0, %v497_v61 }
  0x3d   :  { %1723 = vmatprep.mubr.msk.f32.mxu0 %vm115_vm0, %v499_v63 }
  0x40   :  { %1724 = vmatmul.mubr.msk.f32.gmra.mrb[12].mxu0 %vm115_vm0, %v501_v0 }
  0x41   :  { %1726 = vmatprep.mubr.msk.f32.mxu0 %vm115_vm0, %v503_v5 }
  0x44   :  { %1727 = vmatmul.mubr.msk.f32.gmra.mrb[14].mxu0 %vm115_vm0, %v505_v11 }
  0x45   :  { %1733 = vmatprep.mubr.msk.f32.mxu0 %vm115_vm0, %v704_v16 }
  0x48   :  { %1734 = vmatmul.mubr.msk.f32.vlgmr.msra.gmra.mrb[0].mxu0 %vm115_vm0, %v706_v7 }
  0x49   :  { %1736 = vmatprep.mubr.msk.f32.mxu0 %vm115_vm0, %v708_v8 }
  0x4c   :  { %1737 = vmatmul.mubr.msk.f32.gmra.mrb[2].mxu0 %vm115_vm0, %v710_v9 }
  0x4d   :  { %1739 = vmatprep.mubr.msk.f32.mxu0 %vm115_vm0, %v712_v10 }
  0x50   :  { %1740 = vmatmul.mubr.msk.f32.gmra.mrb[4].mxu0 %vm115_vm0, %v714_v13 }
  0x51   :  { %1742 = vmatprep.mubr.msk.f32.mxu0 %vm115_vm0, %v716_v14 }
  0x54   :  { %1743 = vmatmul.mubr.msk.f32.gmra.mrb[6].mxu0 %vm115_vm0, %v718_v21 }
  0x55   :  { %1745 = vmatprep.mubr.msk.f32.mxu0 %vm115_vm0, %v720_v23 }
  0x58   :  { %1746 = vmatmul.mubr.msk.f32.gmra.mrb[8].mxu0 %vm115_vm0, %v722_v27 }
  0x59   :  { %1748 = vmatprep.mubr.msk.f32.mxu0 %vm115_vm0, %v724_v30 }
  0x5c   :  { %1749 = vmatmul.mubr.msk.f32.gmra.mrb[10].mxu0 %vm115_vm0, %v726_v33 }
  0x5d   :  { %1751 = vmatprep.mubr.msk.f32.mxu0 %vm115_vm0, %v728_v38 }
  0x60   :  { %1752 = vmatmul.mubr.msk.f32.gmra.mrb[12].mxu0 %vm115_vm0, %v730_v45 }
  0x61   :  { %1754 = vmatprep.mubr.msk.f32.mxu0 %vm115_vm0, %v732_v15 }
  0x64   :  { %1755 = vmatmul.mubr.msk.f32.gmra.mrb[14].mxu0 %vm115_vm0, %v734_v49 }
  0xeb   :  { %v1651_v35 = vpop.f32.mrb[0].mxu1 }
  0xec   :  { %v214_v37 = vpop.f32.mrb[1].mxu1 }
  0xef   :  { %v1654_v39 = vpop.f32.mrb[2].mxu1 }
  0xf0   :  { %v224_v40 = vpop.f32.mrb[3].mxu1 }
  0xf3   :  { %v1657_v41 = vpop.f32.mrb[4].mxu1 }
  0xf4   :  { %v234_v42 = vpop.f32.mrb[5].mxu1 }
  0xf7   :  { %v1660_v43 = vpop.f32.mrb[6].mxu1 }
  0xf8   :  { %v244_v44 = vpop.f32.mrb[7].mxu1 }
  0xfb   :  { %v1663_v46 = vpop.f32.mrb[8].mxu1 }
  0xfc   :  { %v254_v47 = vpop.f32.mrb[9].mxu1 }
  0xff   :  { %v1666_v48 = vpop.f32.mrb[10].mxu1 }
 0x100   :  { %v264_v50 = vpop.f32.mrb[11].mxu1 }
 0x103   :  { %v1669_v51 = vpop.f32.mrb[12].mxu1 }
 0x104   :  { %v274_v52 = vpop.f32.mrb[13].mxu1 }
 0x107   :  { %v1672_v53 = vpop.f32.mrb[14].mxu1 }
 0x108   :  { %v284_v54 = vpop.f32.mrb[15].mxu1 }
 0x11b   :  { %v1735_v55 = vpop.f32.mrb[0].mxu0 }
 0x11c   :  { %v1861_v57 = vadd.f32 %v1735_v55, %v1651_v35  ;;  %v833_v58 = vpop.f32.mrb[1].mxu0 }
 0x11d   :  { %v1862_v59 = vadd.f32 %v833_v58, %v214_v37 }
 0x11e   :  { %v929_v62 = vmul.f32 %v1861_v57, %v1861_v57 }
 0x11f   :  { %v928_v60 = vmul.f32 %v1862_v59, %v1862_v59  ;;  %v1738_v61 = vpop.f32.mrb[2].mxu0 }
 0x120   :  { %v1863_v63 = vadd.f32 %v1738_v61, %v1654_v39  ;;  %v843_v0 = vpop.f32.mrb[3].mxu0 }
 0x121   :  { %v1864_v1 = vadd.f32 %v843_v0, %v224_v40  ;;  %1789 = vmatprep.mubr.f32.mxu1 %v928_v60 }
 0x122   :  { %1790 = vmatmul.mubr.f32.vlgmr.msra.gmra.mrb[16].mxu1 %v929_v62  ;;  %v931_v5 = vmul.f32 %v1863_v63, %v1863_v63 }
 0x123   :  { %v930_v3 = vmul.f32 %v1864_v1, %v1864_v1  ;;  %v1741_v4 = vpop.f32.mrb[4].mxu0 }
 0x124   :  { %v1865_v6 = vadd.f32 %v1741_v4, %v1657_v41  ;;  %v853_v11 = vpop.f32.mrb[5].mxu0 }
 0x125   :  { %v1866_v12 = vadd.f32 %v853_v11, %v234_v42  ;;  %1792 = vmatprep.mubr.f32.mxu1 %v930_v3 }
 0x126   :  { %1793 = vmatmul.mubr.f32.gmra.mrb[18].mxu1 %v931_v5  ;;  %v933_v7 = vmul.f32 %v1865_v6, %v1865_v6 }
 0x127   :  { %v932_v16 = vmul.f32 %v1866_v12, %v1866_v12  ;;  %v1744_v2 = vpop.f32.mrb[6].mxu0 }
 0x128   :  { %v1867_v17 = vadd.f32 %v1744_v2, %v1660_v43  ;;  %v863_v8 = vpop.f32.mrb[7].mxu0 }
 0x129   :  { %v1868_v18 = vadd.f32 %v863_v8, %v244_v44  ;;  %1795 = vmatprep.mubr.f32.mxu1 %v932_v16 }
 0x12a   :  { %1796 = vmatmul.mubr.f32.gmra.mrb[20].mxu1 %v933_v7  ;;  %v935_v10 = vmul.f32 %v1867_v17, %v1867_v17 }
 0x12b   :  { %v934_v9 = vmul.f32 %v1868_v18, %v1868_v18  ;;  %v1747_v19 = vpop.f32.mrb[8].mxu0 }
 0x12c   :  { %v1869_v20 = vadd.f32 %v1747_v19, %v1663_v46  ;;  %v873_v13 = vpop.f32.mrb[9].mxu0  ;;  %v1204_v46 = vlaneseq }
 0x12d   :  { %v1870_v22 = vadd.f32 %v873_v13, %v254_v47  ;;  %1798 = vmatprep.mubr.f32.mxu1 %v934_v9 }
 0x12e   :  { %1799 = vmatmul.mubr.f32.gmra.mrb[22].mxu1 %v935_v10  ;;  %v937_v21 = vmul.f32 %v1869_v20, %v1869_v20 }
 0x12f   :  { %v936_v14 = vmul.f32 %v1870_v22, %v1870_v22  ;;  %v1750_v24 = vpop.f32.mrb[10].mxu0 }
 0x130   :  { %v1871_v25 = vadd.f32 %v1750_v24, %v1666_v48  ;;  %v883_v23 = vpop.f32.mrb[11].mxu0 }
 0x131   :  { %v1872_v26 = vadd.f32 %v883_v23, %v264_v50  ;;  %1801 = vmatprep.mubr.f32.mxu1 %v936_v14 }
 0x132   :  { %1802 = vmatmul.mubr.f32.gmra.mrb[24].mxu1 %v937_v21  ;;  %v939_v30 = vmul.f32 %v1871_v25, %v1871_v25 }
 0x133   :  { %v938_v27 = vmul.f32 %v1872_v26, %v1872_v26  ;;  %v1753_v28 = vpop.f32.mrb[12].mxu0 }
 0x134   :  { %v1873_v29 = vadd.f32 %v1753_v28, %v1669_v51  ;;  %v893_v33 = vpop.f32.mrb[13].mxu0 }
 0x135   :  { %v1874_v31 = vadd.f32 %v893_v33, %v274_v52  ;;  %1804 = vmatprep.mubr.f32.mxu1 %v938_v27  ;;  %v1205_v52 = vand.u32 127, %v1204_v46 }
 0x136   :  { %1805 = vmatmul.mubr.f32.gmra.mrb[26].mxu1 %v939_v30  ;;  %v941_v32 = vmul.f32 %v1873_v29, %v1873_v29 }
 0x137   :  { %v940_v38 = vmul.f32 %v1874_v31, %v1874_v31  ;;  %v1756_v45 = vpop.f32.mrb[14].mxu0  ;;  %vm1222_vm4 = vcmp.lt.s32.totalorder %v1205_v52, 20 }
 0x138   :  { %v1875_v15 = vadd.f32 %v1756_v45, %v1672_v53  ;;  %v903_v49 = vpop.f32.mrb[15].mxu0 }
 0x139   :  { %v1876_v56 = vadd.f32 %v903_v49, %v284_v54  ;;  %1807 = vmatprep.mubr.f32.mxu1 %v940_v38 }
 0x13a   :  { %1808 = vmatmul.mubr.f32.gmra.mrb[28].mxu1 %v941_v32  ;;  %v943_v36 = vmul.f32 %v1875_v15, %v1875_v15 }
 0x13b   :  { %v942_v34 = vmul.f32 %v1876_v56, %v1876_v56 }
 0x13d   :  { %1810 = vmatprep.mubr.f32.mxu1 %v942_v34 }
 0x13e   :  { %1811 = vmatmul.mubr.f32.gmra.mrb[30].mxu1 %v943_v36 }
 0x1f5   :  { %v1791_v35 = vpop.f32.mrb[16].mxu1 }
 0x1f6   :  { %v1106_v37 = vmax.f32 %v1791_v35, 1e-10  ;;  %v1026_v39 = vpop.f32.mrb[17].mxu1 }
 0x1f7   :  { %v1105_v40 = vmax.f32 %v1026_v39, 1e-10 }
 0x1f8   :  { %1915 = vlog2.f32 %v1106_v37 }
 0x1f9   :  { %1917 = vlog2.f32 %v1105_v40  ;;  %v1794_v41 = vpop.f32.mrb[18].mxu1 }
 0x1fa   :  { %v1108_v42 = vmax.f32 %v1794_v41, 1e-10  ;;  %v1036_v43 = vpop.f32.mrb[19].mxu1 }
 0x1fb   :  { %v1107_v44 = vmax.f32 %v1036_v43, 1e-10 }
 0x1fc   :  { %1919 = vlog2.f32 %v1108_v42 }
 0x1fd   :  { %1921 = vlog2.f32 %v1107_v44  ;;  %v1797_v47 = vpop.f32.mrb[20].mxu1 }
 0x1fe   :  { %v1110_v48 = vmax.f32 %v1797_v47, 1e-10  ;;  %v1046_v50 = vpop.f32.mrb[21].mxu1 }
 0x1ff   :  { %v1109_v51 = vmax.f32 %v1046_v50, 1e-10 }
 0x200   :  { %1923 = vlog2.f32 %v1110_v48 }
 0x201   :  { %1925 = vlog2.f32 %v1109_v51  ;;  %v1800_v53 = vpop.f32.mrb[22].mxu1 }
 0x202   :  { %v1916_v54 = vpop.eup %1915  ;;  %v1112_v55 = vmax.f32 %v1800_v53, 1e-10  ;;  %v1056_v57 = vpop.f32.mrb[23].mxu1 }
 0x203   :  { %v1918_v58 = vpop.eup %1917  ;;  %v1124_v59 = vmul.f32 0.6931472, %v1916_v54  ;;  %v1111_v60 = vmax.f32 %v1056_v57, 1e-10 }
 0x204   :  { %v1122_v61 = vmul.f32 0.6931472, %v1918_v58  ;;  %1927 = vlog2.f32 %v1112_v55 }
 0x205   :  { %v1154_v62 = vmul.f32 4.3429446, %v1124_v59  ;;  %1929 = vlog2.f32 %v1111_v60  ;;  %v1803_v63 = vpop.f32.mrb[24].mxu1 }
 0x206   :  { %v1920_v0 = vpop.eup %1919  ;;  %v1153_v1 = vmul.f32 4.3429446, %v1122_v61  ;;  %v1114_v3 = vmax.f32 %v1803_v63, 1e-10  ;;  %v1066_v4 = vpop.f32.mrb[25].mxu1 }
 0x207   :  { %v1922_v5 = vpop.eup %1921  ;;  %v1128_v6 = vmul.f32 0.6931472, %v1920_v0  ;;  %v1113_v11 = vmax.f32 %v1066_v4, 1e-10  ;;  %v1240_v12 = vsel %vm1222_vm4, %v1154_v62, -1e+30 }
 0x208   :  { %v1497_v16 = vpack.c.bf16 %v1154_v62, %v1153_v1  ;;  %v1126_v2 = vmul.f32 0.6931472, %v1922_v5  ;;  %1931 = vlog2.f32 %v1114_v3  ;;  %v1239_v7 = vsel %vm1222_vm4, %v1153_v1, -1e+30 }
 0x209   :  { %v1156_v17 = vmul.f32 4.3429446, %v1128_v6  ;;  %1933 = vlog2.f32 %v1113_v11  ;;  %v1806_v8 = vpop.f32.mrb[26].mxu1  ;;  %v1255_v18 = vmax.f32 %v1239_v7, -1e+30 }
 0x20a   :  { %v1924_v9 = vpop.eup %1923  ;;  %1498 = vst [vmem:[#allocation2] sm:$0xff] %v1497_v16   ;;  %v1155_v19 = vmul.f32 4.3429446, %v1126_v2  ;;  %v1116_v10 = vmax.f32 %v1806_v8, 1e-10  ;;  %v1076_v20 = vpop.f32.mrb[27].mxu1 }
 0x20b   :  { %v1926_v13 = vpop.eup %1925  ;;  %v1132_v22 = vmul.f32 0.6931472, %v1924_v9  ;;  %v1115_v14 = vmax.f32 %v1076_v20, 1e-10  ;;  %v1256_v24 = vmax.f32 %v1240_v12, -1e+30 }
 0x20c   :  { %v1502_v21 = vpack.c.bf16 %v1156_v17, %v1155_v19  ;;  %v1130_v25 = vmul.f32 0.6931472, %v1926_v13  ;;  %1935 = vlog2.f32 %v1116_v10  ;;  %v1259_v23 = vmax.f32 %v1255_v18, -1e+30 }
 0x20d   :  { %v1158_v26 = vmul.f32 4.3429446, %v1132_v22  ;;  %1937 = vlog2.f32 %v1115_v14  ;;  %v1809_v27 = vpop.f32.mrb[28].mxu1  ;;  %v1260_v28 = vmax.f32 %v1256_v24, -1e+30 }
 0x20e   :  { %v1928_v30 = vpop.eup %1927  ;;  %1534 = vst [vmem:[#allocation2 + $0x8] sm:$0xff] %v1502_v21   ;;  %v1157_v29 = vmul.f32 4.3429446, %v1130_v25  ;;  %v1118_v33 = vmax.f32 %v1809_v27, 1e-10  ;;  %v1086_v31 = vpop.f32.mrb[29].mxu1 }
 0x20f   :  { %v1930_v38 = vpop.eup %1929  ;;  %v1136_v45 = vmul.f32 0.6931472, %v1928_v30  ;;  %v1117_v32 = vmax.f32 %v1086_v31, 1e-10  ;;  %v1263_v15 = vmax.f32 %v1259_v23, -1e+30 }
 0x210   :  { %v1507_v49 = vpack.c.bf16 %v1158_v26, %v1157_v29  ;;  %v1134_v56 = vmul.f32 0.6931472, %v1930_v38  ;;  %1939 = vlog2.f32 %v1118_v33  ;;  %v1264_v34 = vmax.f32 %v1260_v28, -1e+30 }
 0x211   :  { %v1160_v36 = vmul.f32 4.3429446, %v1136_v45  ;;  %1941 = vlog2.f32 %v1117_v32  ;;  %v1812_v35 = vpop.f32.mrb[30].mxu1 }
 0x212   :  { %v1932_v37 = vpop.eup %1931  ;;  %1535 = vst [vmem:[#allocation2 + $0x10] sm:$0xff] %v1507_v49   ;;  %v1159_v39 = vmul.f32 4.3429446, %v1134_v56  ;;  %v1120_v40 = vmax.f32 %v1812_v35, 1e-10  ;;  %v1096_v41 = vpop.f32.mrb[31].mxu1  ;;  %v1267_v42 = vmax.f32 %v1263_v15, %v1264_v34 }
 0x213   :  { %v1934_v43 = vpop.eup %1933  ;;  %v1140_v44 = vmul.f32 0.6931472, %v1932_v37  ;;  %v1119_v46 = vmax.f32 %v1096_v41, 1e-10 }
 0x214   :  { %v1512_v47 = vpack.c.bf16 %v1160_v36, %v1159_v39  ;;  %v1138_v48 = vmul.f32 0.6931472, %v1934_v43  ;;  %1943 = vlog2.f32 %v1120_v40  ;;  %v1269_v50 = vmax.f32 %v1267_v42, -1e+30 }
 0x215   :  { %v1162_v51 = vmul.f32 4.3429446, %v1140_v44  ;;  %1945 = vlog2.f32 %v1119_v46 }
 0x216   :  { %v1936_v52 = vpop.eup %1935  ;;  %1536 = vst [vmem:[#allocation2 + $0x18] sm:$0xff] %v1512_v47   ;;  %v1161_v53 = vmul.f32 4.3429446, %v1138_v48  ;;  %1270 = vmax.xlane.f32.xlu0 %v1269_v50 }
 0x217   :  { %v1938_v54 = vpop.eup %1937  ;;  %v1144_v55 = vmul.f32 0.6931472, %v1936_v52 }
 0x218   :  { %v1517_v57 = vpack.c.bf16 %v1162_v51, %v1161_v53  ;;  %v1142_v58 = vmul.f32 0.6931472, %v1938_v54 }
 0x219   :  { %v1164_v59 = vmul.f32 4.3429446, %v1144_v55 }
 0x21a   :  { %v1940_v60 = vpop.eup %1939  ;;  %1537 = vst [vmem:[#allocation2 + $0x20] sm:$0xff] %v1517_v57   ;;  %v1163_v61 = vmul.f32 4.3429446, %v1142_v58 }
 0x21b   :  { %v1942_v62 = vpop.eup %1941  ;;  %v1148_v63 = vmul.f32 0.6931472, %v1940_v60 }
 0x21c   :  { %v1522_v0 = vpack.c.bf16 %v1164_v59, %v1163_v61  ;;  %v1146_v1 = vmul.f32 0.6931472, %v1942_v62 }
 0x21d   :  { %v1166_v3 = vmul.f32 4.3429446, %v1148_v63 }
 0x21e   :  { %v1944_v4 = vpop.eup %1943  ;;  %1538 = vst [vmem:[#allocation2 + $0x28] sm:$0xff] %v1522_v0   ;;  %v1165_v5 = vmul.f32 4.3429446, %v1146_v1 }
 0x21f   :  { %v1946_v6 = vpop.eup %1945  ;;  %v1152_v11 = vmul.f32 0.6931472, %v1944_v4 }
 0x220   :  { %v1527_v12 = vpack.c.bf16 %v1166_v3, %v1165_v5  ;;  %v1150_v16 = vmul.f32 0.6931472, %v1946_v6 }
 0x221   :  { %v1168_v2 = vmul.f32 4.3429446, %v1152_v11 }
 0x222   :  { %1539 = vst [vmem:[#allocation2 + $0x30] sm:$0xff] %v1527_v12   ;;  %v1167_v7 = vmul.f32 4.3429446, %v1150_v16 }
 0x224   :  { %v1532_v17 = vpack.c.bf16 %v1168_v2, %v1167_v7 }
 0x226   :  { %1540 = vst [vmem:[#allocation2 + $0x38] sm:$0xff] %v1532_v17  }
 0x227   :  { %1958 = shalt.err (!%p1955_p4)
}
 0x228   :  { %s1959_s2 = scalar_lea.hbm %s2397_s4, 1024 }
 0x229   :  { %p1960_p5 = scmp.ne.s32.totalorder %s2397_s4, %s1959_s2  ;;  %p1963_p6 = scmp.lt.u32.totalorder %s1959_s2, %s2397_s4 }
 0x22b   :  { %p1965_p7 = pnand %p1963_p6, %p1960_p5 }
 0x22d   :  { %1968 = shalt.err (!%p1965_p7)
}
 0x22e   :  { %s1996_s28 = smov 64   ;;  %s1997_s29 = smov 4  }
 0x22f   :  { %1372 = dma.vmem_to_hbm [thread:$0]  %s1367_s21, 1024, %s2397_s4, [#allocation3], %s1996_s28, %s1996_s28, %s1997_s29  }
 0x230   :  { %s1998_s7 = smov [#allocation4]  }
 0x231   :  { %s1379_s8 = sshll.u32 %s1998_s7, 4  ;;  %s1380_s8 = int_to_ptr.vmem [resolvable:$true] %s1379_s8 }
 0x232   :  { %s1969_s10 = scalar_lea.vmem %s1380_s8, 128  ;;  %p1974_p9 = scmp.lt.s32.totalorder %s1380_s8, %s1380_s8 }
 0x233   :  { %p1970_p8 = scmp.ne.s32.totalorder %s1380_s8, %s1969_s10  ;;  %p1975_p10 = scmp.lt.s32.totalorder %s1969_s10, %s1969_s10 }
 0x235   :  { %p1976_p11 = por %p1975_p10, %p1974_p9 }
 0x237   :  { %p1977_p12 = pnand %p1976_p11, %p1970_p8 }
 0x2a3   :  { %v1271_v8 = vpop.xlane.xlu0 %1270 }
 0x2a4   :  { %v1272_v18 = vrot.slane %v1271_v8, 4 }
 0x2a6   :  { %v1273_v9 = vmax.f32 %v1271_v8, %v1272_v18 }
 0x2a8   :  { %v1274_v19 = vrot.slane %v1273_v9, 2 }
 0x2aa   :  { %v1275_v10 = vmax.f32 %v1273_v9, %v1274_v19 }
 0x2ac   :  { %v1276_v20 = vrot.slane %v1275_v10, 1 }
 0x2ae   :  { %v1277_v13 = vmax.f32 %v1275_v10, %v1276_v20 }
 0x2b0   :  { %1909 = vpush %v1277_v13 }
 0x2e1   :  { %s1910_s9 = spop %1909 }
 0x2e2   :  { %v1279_v22 = vstv %s1910_s9 }
 0x2e3   :  { %1280 = vst [vmem:[#allocation4] sm:$0xff] %v1279_v22 }
 0x2e4   :  { %1980 = shalt.err (!%p1977_p12)
}
 0x2e5   :  { %s1981_s12 = scalar_lea.hbm %s2398_s5, 128 }
 0x2e6   :  { %p1982_p13 = scmp.ne.s32.totalorder %s2398_s5, %s1981_s12  ;;  %p1985_p0 = scmp.lt.u32.totalorder %s1981_s12, %s2398_s5 }
 0x2e8   :  { %p1987_p1 = pnand %p1985_p0, %p1982_p13 }
 0x2ea   :  { %1990 = shalt.err (!%p1987_p1)
}
 0x2eb   :  { %1382 = dma.vmem_to_hbm [thread:$0]  %s1380_s8, 128, %s2398_s5, [#allocation5]  }
 0x2ec   :  { %1991 = dma.done.wait [#allocation3], 1024  }
 0x2ed   :  { %1992 = vsyncadd [#allocation3], 4294966272 }
 0x2ee   :  { %1993 = dma.done.wait [#allocation5], 128  }
 0x2ef   :  { %1994 = vsyncadd [#allocation5], 4294967168 }
 0x2f0   :  { %1389 = vsyncpa [#allocation3], 1 }
 0x2f1   :  { %1390 = vsyncpa [#allocation5], 1 }

</bundles_post_ra>
